<compile_context>
chip_gen: v5e
topology: v5e:2x2
jax: 0.10.0
libtpu: 0.0.40
codegen_flags: <defaults>
</compile_context>

<pallas_src>
import jax
import jax.numpy as jnp
from jax.experimental import pallas as pl
from jax.experimental.pallas import tpu as pltpu


def gate_gcn_kernel(a_ref, x0_ref, wc_ref, bc_ref, w12_ref, bg_ref, out_ref):
    """One grid step == one GCN layer; out_ref is the resident layer carry."""
    f32 = jnp.float32
    cd = a_ref.dtype                      # MXU operand dtype (f32 or bf16)
    l = pl.program_id(0)

    @pl.when(l == 0)
    def _():
        out_ref[...] = x0_ref[...]        # seed the carry with the input feats

    x = out_ref[...]                      # (Np, Dp) f32 carry (prev layer out)

    # GraphConv layer l:  A_hat @ x @ Wc_l + bc_l   (f32 accumulation on MXU)
    agg = jnp.dot(a_ref[...], x.astype(cd), preferred_element_type=f32)
    h = (jnp.dot(agg.astype(cd), wc_ref[0], preferred_element_type=f32)
         + bc_ref[0].astype(f32))
    next_x = jnp.where(h > 0, h, 0.01 * h)          # LeakyReLU(0.01)

    # Shared GatedLayer: sigmoid(x @ W1 + next_x @ W2 + bg), fused into a
    # single K = 2*Dp matmul against the pre-concatenated [W1; W2].
    gate_in = jnp.concatenate([x, next_x], axis=-1).astype(cd)
    s = jax.nn.sigmoid(
        jnp.dot(gate_in, w12_ref[...], preferred_element_type=f32)
        + bg_ref[...].astype(f32))

    # x * s + next_x * (1 - s)  ==  next_x + s * (x - next_x)
    out_ref[...] = next_x + s * (x - next_x)


def _round_up(v, m):
    return (v + m - 1) // m * m


def gate_gcn_forward(a_hat, x, wc, bc, w1, w2, bg, *, compute_dtype=jnp.float32):
    """Pad to lane/sublane-dense shapes, run the layered kernel, slice back."""
    N, D = x.shape
    L = wc.shape[0]
    Np = _round_up(N, 16)     # sublane-dense (covers bf16 (16,128) packing)
    Dp = _round_up(D, 128)    # lane-dense feature dim

    f32 = jnp.float32
    cd = compute_dtype

    def pad2(arr, r, c):
        return jnp.pad(arr, ((0, r - arr.shape[0]), (0, c - arr.shape[1])))

    a_p = pad2(a_hat, Np, Np).astype(cd)
    x_p = pad2(x, Np, Dp).astype(f32)                 # carry seed stays f32
    wc_p = jnp.pad(wc, ((0, 0), (0, Dp - D), (0, Dp - D))).astype(cd)
    bc_p = jnp.pad(bc, ((0, 0), (0, 0), (0, Dp - D))).astype(cd)
    # Fused gate weight [W1; W2], each block padded to (Dp, Dp).
    w12_p = jnp.concatenate([pad2(w1, Dp, Dp), pad2(w2, Dp, Dp)], axis=0).astype(cd)
    bg_p = jnp.pad(bg, ((0, 0), (0, Dp - D))).astype(cd)

    out_p = pl.pallas_call(
        gate_gcn_kernel,
        out_shape=jax.ShapeDtypeStruct((Np, Dp), f32),
        grid=(L,),
        in_specs=[
            pl.BlockSpec((Np, Np), lambda l: (0, 0)),        # A_hat (resident)
            pl.BlockSpec((Np, Dp), lambda l: (0, 0)),        # x0    (resident)
            pl.BlockSpec((1, Dp, Dp), lambda l: (l, 0, 0)),  # Wc[l]  streamed
            pl.BlockSpec((1, 1, Dp), lambda l: (l, 0, 0)),   # bc[l]  streamed
            pl.BlockSpec((2 * Dp, Dp), lambda l: (0, 0)),    # [W1;W2] (resident)
            pl.BlockSpec((1, Dp), lambda l: (0, 0)),         # bg    (resident)
        ],
        out_specs=pl.BlockSpec((Np, Dp), lambda l: (0, 0)),  # resident carry
        compiler_params=pltpu.CompilerParams(
            dimension_semantics=("arbitrary",)),             # layer carry
    )(a_p, x_p, wc_p, bc_p, w12_p, bg_p)

    return out_p[:N, :D]


def reference_forward(a_hat, x, wc, bc, w1, w2, bg, compute_dtype=jnp.float32):
    """Pure-JAX reference mirroring the kernel's operand dtypes (f32 == exact
    original PyTorch semantics)."""
    f32 = jnp.float32
    cd = compute_dtype
    a = a_hat.astype(cd)
    wc_c = wc.astype(cd)
    w1_c = w1.astype(cd)
    w2_c = w2.astype(cd)
    bc_c = bc.astype(cd).astype(f32)
    bg_c = bg.astype(cd).astype(f32)
    x = x.astype(f32)
    for l in range(wc.shape[0]):
        agg = jnp.dot(a, x.astype(cd), preferred_element_type=f32)
        h = jnp.dot(agg.astype(cd), wc_c[l], preferred_element_type=f32) + bc_c[l]
        nx = jnp.where(h > 0, h, 0.01 * h)
        s = jax.nn.sigmoid(
            jnp.dot(x.astype(cd), w1_c, preferred_element_type=f32)
            + jnp.dot(nx.astype(cd), w2_c, preferred_element_type=f32) + bg_c)
        x = x * s + nx * (1.0 - s)
    return x


def build_normalized_adjacency(key, n_nodes):
    """Random symmetric graph; remove self loops, add self loops, norm='both'."""
    m = jax.random.bernoulli(key, p=0.25, shape=(n_nodes, n_nodes)).astype(jnp.float32)
    a = jnp.maximum(m, m.T)
    a = a * (1.0 - jnp.eye(n_nodes, dtype=jnp.float32))
    a = a + jnp.eye(n_nodes, dtype=jnp.float32)
    deg = jnp.sum(a, axis=1)
    d_inv_sqrt = 1.0 / jnp.sqrt(deg)
    return a * d_inv_sqrt[:, None] * d_inv_sqrt[None, :]


if __name__ == "__main__":
    N = 16          # number of graph nodes
    D = 32          # in_feat_dim
    L = 3           # num_layers
    # drop_out / drop_edge are identity in eval mode; share_gate_layer=False.

    key = jax.random.PRNGKey(0)
    k_adj, k_x, k_wc, k_bc, k_w1, k_w2, k_bg = jax.random.split(key, 7)

    a_hat = build_normalized_adjacency(k_adj, N)
    x = jax.random.normal(k_x, (N, D), dtype=jnp.float32)

    # GraphConv params per layer: weight (D, D) applied as feat @ W, bias (1, D)
    wc = 0.1 * jax.random.normal(k_wc, (L, D, D), dtype=jnp.float32)
    bc = 0.1 * jax.random.normal(k_bc, (L, 1, D), dtype=jnp.float32)
    # Shared GatedLayer params (Linear weights pre-transposed: y = x @ W)
    w1 = 0.1 * jax.random.normal(k_w1, (D, D), dtype=jnp.float32)
    w2 = 0.1 * jax.random.normal(k_w2, (D, D), dtype=jnp.float32)
    bg = 0.1 * jax.random.normal(k_bg, (1, D), dtype=jnp.float32)

    # f32 path: matches the original module semantics exactly (tight check).
    out_f32 = gate_gcn_forward(a_hat, x, wc, bc, w1, w2, bg,
                               compute_dtype=jnp.float32)
    out_f32 = jax.block_until_ready(out_f32)
    ref_f32 = reference_forward(a_hat, x, wc, bc, w1, w2, bg)
    assert out_f32.shape == (N, D)
    assert jnp.allclose(out_f32, ref_f32, atol=1e-4, rtol=1e-4)

    # bf16 MXU operands, f32 accumulation / element-wise (v6e/v7x fast path).
    out_bf16 = gate_gcn_forward(a_hat, x, wc, bc, w1, w2, bg,
                                compute_dtype=jnp.bfloat16)
    out_bf16 = jax.block_until_ready(out_bf16)
    ref_bf16 = reference_forward(a_hat, x, wc, bc, w1, w2, bg,
                                 compute_dtype=jnp.bfloat16)
    assert out_bf16.shape == (N, D)
    assert jnp.allclose(out_bf16, ref_bf16, atol=2e-2, rtol=2e-2)

    print("KERNEL_OK")
</pallas_src>

<mosaic_0001>
module attributes {stable_mosaic.version = 11 : i64} {
  func.func @gate_gcn_kernel(%arg0: i32, %arg1: memref<16x16xf32, #tpu.memory_space<vmem>>, %arg2: memref<16x128xf32, #tpu.memory_space<vmem>>, %arg3: memref<1x128x128xf32, #tpu.memory_space<vmem>>, %arg4: memref<1x1x128xf32, #tpu.memory_space<vmem>>, %arg5: memref<256x128xf32, #tpu.memory_space<vmem>>, %arg6: memref<1x128xf32, #tpu.memory_space<vmem>>, %arg7: memref<16x128xf32, #tpu.memory_space<vmem>>) attributes {dimension_semantics = [#tpu.dimension_semantics<arbitrary>], iteration_bounds = array<i64: 3>, scalar_prefetch = 0 : i64, scratch_operands = 0 : i64, tpu.core_type = #tpu.core_type<tc>, window_params = [{pipeline_mode = #tpu.pipeline_mode<synchronous>, transform_indices = @transform_0, window_bounds = array<i64: 16, 16>}, {pipeline_mode = #tpu.pipeline_mode<synchronous>, transform_indices = @transform_1, window_bounds = array<i64: 16, 128>}, {transform_indices = @transform_2, window_bounds = array<i64: 1, 128, 128>}, {transform_indices = @transform_3, window_bounds = array<i64: 1, 1, 128>}, {pipeline_mode = #tpu.pipeline_mode<synchronous>, transform_indices = @transform_4, window_bounds = array<i64: 256, 128>}, {pipeline_mode = #tpu.pipeline_mode<synchronous>, transform_indices = @transform_5, window_bounds = array<i64: 1, 128>}, {pipeline_mode = #tpu.pipeline_mode<synchronous>, transform_indices = @transform_6, window_bounds = array<i64: 16, 128>}]} {
    %c0_i32 = arith.constant 0 : i32
    %0 = arith.cmpi eq, %arg0, %c0_i32 : i32
    %1 = arith.extui %0 : i1 to i32
    %c0_i32_0 = arith.constant 0 : i32
    %2 = arith.cmpi ne, %1, %c0_i32_0 : i32
    scf.if %2 {
      %c0_21 = arith.constant 0 : index
      %c0_22 = arith.constant 0 : index
      %33 = vector.load %arg2[%c0_21, %c0_22] : memref<16x128xf32, #tpu.memory_space<vmem>>, vector<16x128xf32>
      %c0_23 = arith.constant 0 : index
      %c0_24 = arith.constant 0 : index
      %34 = vector.load %arg7[%c0_23, %c0_24] : memref<16x128xf32, #tpu.memory_space<vmem>>, vector<16x128xf32>
      tpu.vector_store %arg7[%c0_23, %c0_24], %33 {strides = array<i32>} : memref<16x128xf32, #tpu.memory_space<vmem>>, vector<16x128xf32>,
    } else {
    }
    %c0 = arith.constant 0 : index
    %c0_1 = arith.constant 0 : index
    %3 = vector.load %arg7[%c0, %c0_1] : memref<16x128xf32, #tpu.memory_space<vmem>>, vector<16x128xf32>
    %c0_2 = arith.constant 0 : index
    %c0_3 = arith.constant 0 : index
    %4 = vector.load %arg1[%c0_2, %c0_3] : memref<16x16xf32, #tpu.memory_space<vmem>>, vector<16x16xf32>
    %cst = arith.constant dense<0.000000e+00> : vector<16x128xf32>
    %5 = tpu.matmul %4, %3, %cst {dimension_numbers = #tpu.dot_dimension_numbers<[1], [0], [0], [1], [0, 0, 1, 1], [], []>} : vector<16x16xf32>, vector<16x128xf32>, vector<16x128xf32> -> vector<16x128xf32>
    %c0_4 = arith.constant 0 : index
    %c0_5 = arith.constant 0 : index
    %c0_6 = arith.constant 0 : index
    %6 = vector.load %arg3[%c0_4, %c0_5, %c0_6] : memref<1x128x128xf32, #tpu.memory_space<vmem>>, vector<1x128x128xf32>
    %7 = vector.shape_cast %6 : vector<1x128x128xf32> to vector<128x128xf32>
    %cst_7 = arith.constant dense<0.000000e+00> : vector<16x128xf32>
    %8 = tpu.matmul %5, %7, %cst_7 {dimension_numbers = #tpu.dot_dimension_numbers<[1], [0], [0], [1], [0, 0, 1, 1], [], []>} : vector<16x128xf32>, vector<128x128xf32>, vector<16x128xf32> -> vector<16x128xf32>
    %c0_8 = arith.constant 0 : index
    %c0_9 = arith.constant 0 : index
    %c0_10 = arith.constant 0 : index
    %9 = vector.load %arg4[%c0_8, %c0_9, %c0_10] : memref<1x1x128xf32, #tpu.memory_space<vmem>>, vector<1x1x128xf32>
    %10 = vector.shape_cast %9 : vector<1x1x128xf32> to vector<1x128xf32>
    %11 = vector.broadcast %10 : vector<1x128xf32> to vector<16x128xf32>
    %12 = arith.addf %8, %11 : vector<16x128xf32>
    %cst_11 = arith.constant 0.000000e+00 : f32
    %13 = vector.broadcast %cst_11 : f32 to vector<16x128xf32>
    %14 = arith.cmpf ogt, %12, %13 : vector<16x128xf32>
    %cst_12 = arith.constant 0.00999999977 : f32
    %15 = vector.broadcast %cst_12 : f32 to vector<16x128xf32>
    %16 = arith.mulf %15, %12 : vector<16x128xf32>
    %17 = arith.select %14, %12, %16 : vector<16x128xi1>, vector<16x128xf32>
    %18 = tpu.concatenate %3, %17 in 1 : vector<16x128xf32>, vector<16x128xf32> -> vector<16x256xf32>
    %c0_13 = arith.constant 0 : index
    %c0_14 = arith.constant 0 : index
    %19 = vector.load %arg5[%c0_13, %c0_14] : memref<256x128xf32, #tpu.memory_space<vmem>>, vector<256x128xf32>
    %cst_15 = arith.constant dense<0.000000e+00> : vector<16x128xf32>
    %20 = tpu.matmul %18, %19, %cst_15 {dimension_numbers = #tpu.dot_dimension_numbers<[1], [0], [0], [1], [0, 0, 1, 1], [], []>} : vector<16x256xf32>, vector<256x128xf32>, vector<16x128xf32> -> vector<16x128xf32>
    %c0_16 = arith.constant 0 : index
    %c0_17 = arith.constant 0 : index
    %21 = vector.load %arg6[%c0_16, %c0_17] : memref<1x128xf32, #tpu.memory_space<vmem>>, vector<1x128xf32>
    %22 = vector.broadcast %21 : vector<1x128xf32> to vector<16x128xf32>
    %23 = arith.addf %20, %22 : vector<16x128xf32>
    %24 = arith.negf %23 : vector<16x128xf32>
    %25 = math.exp %24 : vector<16x128xf32>
    %cst_18 = arith.constant 1.000000e+00 : f32
    %26 = vector.broadcast %cst_18 : f32 to vector<16x128xf32>
    %27 = arith.addf %26, %25 : vector<16x128xf32>
    %28 = arith.divf %26, %27 : vector<16x128xf32>
    %29 = arith.subf %3, %17 : vector<16x128xf32>
    %30 = arith.mulf %28, %29 : vector<16x128xf32>
    %31 = arith.addf %17, %30 : vector<16x128xf32>
    %c0_19 = arith.constant 0 : index
    %c0_20 = arith.constant 0 : index
    %32 = vector.load %arg7[%c0_19, %c0_20] : memref<16x128xf32, #tpu.memory_space<vmem>>, vector<16x128xf32>
    tpu.vector_store %arg7[%c0_19, %c0_20], %31 {strides = array<i32>} : memref<16x128xf32, #tpu.memory_space<vmem>>, vector<16x128xf32>,
    return
  }
  func.func @transform_0(%arg0: i32) -> (i32, i32) {
    %c0_i32 = arith.constant 0 : i32
    %c0_i32_0 = arith.constant 0 : i32
    %c0_i32_1 = arith.constant 0 : i32
    return %c0_i32, %c0_i32_0 : i32, i32
  }
  func.func @transform_1(%arg0: i32) -> (i32, i32) {
    %c0_i32 = arith.constant 0 : i32
    %c0_i32_0 = arith.constant 0 : i32
    %c0_i32_1 = arith.constant 0 : i32
    return %c0_i32, %c0_i32_0 : i32, i32
  }
  func.func @transform_2(%arg0: i32) -> (i32, i32, i32) {
    %c0_i32 = arith.constant 0 : i32
    %c0_i32_0 = arith.constant 0 : i32
    %c0_i32_1 = arith.constant 0 : i32
    return %arg0, %c0_i32, %c0_i32_0 : i32, i32, i32
  }
  func.func @transform_3(%arg0: i32) -> (i32, i32, i32) {
    %c0_i32 = arith.constant 0 : i32
    %c0_i32_0 = arith.constant 0 : i32
    %c0_i32_1 = arith.constant 0 : i32
    return %arg0, %c0_i32, %c0_i32_0 : i32, i32, i32
  }
  func.func @transform_4(%arg0: i32) -> (i32, i32) {
    %c0_i32 = arith.constant 0 : i32
    %c0_i32_0 = arith.constant 0 : i32
    %c0_i32_1 = arith.constant 0 : i32
    return %c0_i32, %c0_i32_0 : i32, i32
  }
  func.func @transform_5(%arg0: i32) -> (i32, i32) {
    %c0_i32 = arith.constant 0 : i32
    %c0_i32_0 = arith.constant 0 : i32
    %c0_i32_1 = arith.constant 0 : i32
    return %c0_i32, %c0_i32_0 : i32, i32
  }
  func.func @transform_6(%arg0: i32) -> (i32, i32) {
    %c0_i32 = arith.constant 0 : i32
    %c0_i32_0 = arith.constant 0 : i32
    %c0_i32_1 = arith.constant 0 : i32
    return %c0_i32, %c0_i32_0 : i32, i32
  }
}

</mosaic_0001>

<bundles_post_ra>
// kernel: tpu_custom_call.1
= control target key start
LH: loop header
LB: loop body
LE: loop exit
PB: predicated region body
PF: predicated region fallthrough
CT: control target
= control target key end

     0   :  { %s1279_s0 = inlined_call_operand.hbm [shape: f32[16,16], index: 0, kind: input, shape index: {}]   ;;  %s1280_s1 = inlined_call_operand.hbm [shape: f32[16,128], index: 1, kind: input, shape index: {}]   ;;  %s1281_s2 = inlined_call_operand.hbm [shape: f32[3,128,128], index: 2, kind: input, shape index: {}]   ;;  %s1282_s3 = inlined_call_operand.hbm [shape: f32[3,1,128], index: 3, kind: input, shape index: {}]   ;;  %s1283_s4 = inlined_call_operand.hbm [shape: f32[256,128], index: 4, kind: input, shape index: {}]   ;;  %s1284_s5 = inlined_call_operand.vmem [shape: f32[1,128], index: 5, kind: input, shape index: {}]   ;;  %s1285_s6 = inlined_call_operand.hbm [shape: f32[16,128], index: 6, kind: output, shape index: {}]  }
   0x1   :  { %1289 = sst [smem:[#allocation16_spill]] %s1279_s0 }
   0x2   :  { %1290 = sst [smem:[#allocation17_spill]] %s1280_s1 }
   0x3   :  { %11 = vsyncpa [#allocation3], 0 }
   0x4   :  { %12 = vsyncpa [#allocation6], 0 }
   0x5   :  { %13 = vsyncpa [#allocation4], 0  ;;  %s1072_s21 = smov 0   ;;  %s1074_s22 = smov 0  }
   0x6   :  { %s1076_s23 = smov 0   ;;  %s1078_s24 = smov 0  }
   0x7 LB: > { %s1091_s25 = sadd.s32 4294967295, %s1027_s24   ;;  %p81_p0 = scmp.ne.s32.totalorder %s1019_s22, %s1015_s21  ;;  %s1027_s24 = sphi %s1078_s24, %s1303_s24   ;;  %s1023_s23 = sphi %s1076_s23, %s1302_s23   ;;  %s1019_s22 = sphi %s1074_s22, %s1301_s22   ;;  %s1015_s21 = sphi %s1072_s21, %s1300_s21  }
   0x8   : > { %p82_p1 = scmp.eq.s32.totalorder %s1091_s25, 0  ;;  %p664_p2 = scmp.ge.s32.totalorder %s1027_s24, 1 }
   0x9   : > { %p181_p3 = scmp.lt.s32.totalorder %s1027_s24, 4  ;;  %p665_p4 = scmp.ne.s32.totalorder %s1091_s25, 0 }
   0xa   : > { %p1100_p5 = por %p82_p1, %p81_p0  ;;  %s1292_s0 = sld [smem:[#allocation16_spill]] }
   0xb   : > { %p1107_p6 = pnand %p664_p2, %p181_p3  ;;  %s1029_s7 = smov [#allocation2]  }
   0xc   : > { %s194_s8 = sshll.u32 %s1029_s7, 4  ;;  %s1295_s1 = sld [smem:[#allocation17_spill]]  ;;  %s195_s8 = int_to_ptr.vmem [resolvable:$true] %s194_s8 }
   0xd   : > { %p723_p7 = pneg %p1107_p6  ;;  %s1287_s13 = smov 128  }
   0xe   : > { %s1031_s14 = smov 8   ;;  %s1032_s15 = smov [#allocation5]  }
   0xf   : > { %p1115_p8 = pnand %p723_p7, %p82_p1  ;;  %s208_s16 = sshll.u32 %s1032_s15, 4  ;;  %s209_s16 = int_to_ptr.vmem [resolvable:$true] %s208_s16 }
  0x10   : > { %s192_s29 = sshll.u32 %s1292_s0, 4  ;;  %s1133_s17 = sadd.s32 1, %s1027_s24   ;;  %s193_s29 = int_to_ptr.hbm [resolvable:$true] %s192_s29 }
  0x11   : > { %726 = dma.hbm_to_vmem [thread:$0]  (!%p1115_p8), %s193_s29, 256, %s195_s8, [#allocation3], %s1287_s13, %s1287_s13, %s1031_s14  }
  0x12   : > { %s206_s12 = sshll.u32 %s1295_s1, 4  ;;  %s68_s18 = sadd.s32 1, %s1023_s23  ;;  %s207_s12 = int_to_ptr.hbm [resolvable:$true] %s206_s12 }
  0x13   : > { %729 = dma.hbm_to_vmem [thread:$0]  (!%p1115_p8), %s207_s12, 256, %s209_s16, [#allocation6], %s1287_s13, %s1287_s13, %s1031_s14  }
  0x14   : > { %s65_s19 = ssub.s32 %s1027_s24, %s1133_s17  ;;  %p75_p9 = scmp.ne.s32.totalorder %s1023_s23, %s1019_s22 }
  0x15   : > { %p66_p10 = scmp.eq.s32.totalorder %s65_s19, 0  ;;  %p76_p11 = scmp.eq.s32.totalorder %s1027_s24, 0 }
  0x16   : > { %p743_p12 = scmp.lt.s32.totalorder %s1027_s24, 3  ;;  %s239_s20 = sand.u32 1, %s1027_s24  }
  0x17   : > { %s1144_s21 = scalar_select %p66_p10, %s1023_s23, %s68_s18  }
  0x18   : > { %p77_p13 = por %p76_p11, %p75_p9  ;;  %s1286_s27 = sand.u32 1, %s1023_s23  }
  0x19   : > { %s686_s28 = sshll.u32 %s1027_s24, 7  ;;  %s669_s29 = sshll.u32 %s1286_s27, 7 }
  0x1a   : > { %s248_s10 = scalar_lea.hbm %s1281_s2, %s686_s28  ;;  %s243_s12 = scalar_lea.vmem [#allocation7], %s669_s29 }
  0x1b   : > { %s249_s11 = sshll.u32 %s248_s10, 4  ;;  %s251_s15 = sshll.u32 %s243_s12, 4  ;;  %s250_s11 = int_to_ptr.hbm [resolvable:$true] %s249_s11  ;;  %s252_s15 = int_to_ptr.vmem [resolvable:$true] %s251_s15 }
  0x1c   : > { %p1155_p0 = pnand %p743_p12, %p77_p13  ;;  %s220_s27 = sshll.u32 %s1283_s4, 4  ;;  %s221_s27 = int_to_ptr.hbm [resolvable:$true] %s220_s27 }
  0x1d   : > { %s1162_s13 = scalar_lea.sflag [#allocation3], %s239_s20  ;;  %s859_s28 = sshra.s32 %s250_s11, 4  ;;  %s860_s28 = int_to_ptr.hbm [resolvable:$true] %s859_s28 }
  0x1e   : > { %s861_s7 = scalar_lea.hbm %s860_s28, 128  ;;  %p863_p3 = pneg %p1155_p0 }
  0x1f   : > { %p862_p2 = scmp.ne.s32.totalorder %s860_s28, %s861_s7  ;;  %s866_s10 = scalar_lea.hbm %s1281_s2, 384 }
  0x20   : > { %p867_p10 = scmp.lt.s32.totalorder %s860_s28, %s1281_s2  ;;  %p868_p11 = scmp.lt.s32.totalorder %s866_s10, %s861_s7 }
  0x21   : > { %p864_p7 = pnand %p863_p3, %p862_p2 }
  0x22   : > { %p869_p12 = por %p868_p11, %p867_p10 }
  0x23   : > { %p865_p9 = pneg %p864_p7 }
  0x25   : > { %p870_p13 = pnand %p869_p12, %p865_p9 }
  0x27   : > { %873 = shalt.err (!%p870_p13)
}
  0x28   : > { %s1297_s20 = smov 128   ;;  %s1033_s19 = smov [#allocation9]  }
  0x29   : > { %736 = dma.hbm_to_vmem [thread:$0]  (!%p1155_p0), %s250_s11, 2048, %s252_s15, %s1162_s13, %s1297_s20, %s1297_s20, %s1031_s14  }
  0x2a   : > { %s222_s29 = sshll.u32 %s1033_s19, 4  ;;  %s267_s7 = scalar_lea.hbm %s1282_s3, %s1027_s24  ;;  %s223_s29 = int_to_ptr.vmem [resolvable:$true] %s222_s29 }
  0x2b   : > { %732 = dma.hbm_to_vmem [thread:$0]  (!%p1115_p8), %s221_s27, 4096, %s223_s29, [#allocation6], %s1297_s20, %s1297_s20, %s1031_s14  }
  0x2c   : > { %s269_s10 = sshll.u32 %s267_s7, 4  ;;  %s1298_s12 = sand.u32 1, %s1023_s23   ;;  %s270_s10 = int_to_ptr.hbm [resolvable:$true] %s269_s10 }
  0x2d   : > { %s264_s18 = scalar_lea.vmem [#allocation8], %s1298_s12  ;;  %s919_s1 = sshra.s32 %s270_s10, 4  ;;  %s920_s1 = int_to_ptr.hbm [resolvable:$true] %s919_s1 }
  0x2e   : > { %s271_s0 = sshll.u32 %s264_s18, 4  ;;  %s921_s11 = scalar_lea.hbm %s920_s1, 1  ;;  %s272_s0 = int_to_ptr.vmem [resolvable:$true] %s271_s0 }
  0x2f   : > { %p922_p2 = scmp.ne.s32.totalorder %s920_s1, %s921_s11  ;;  %s926_s15 = scalar_lea.hbm %s1282_s3, 3 }
  0x30   : > { %p927_p8 = scmp.lt.s32.totalorder %s920_s1, %s1282_s3  ;;  %p928_p10 = scmp.lt.s32.totalorder %s926_s15, %s921_s11 }
  0x31   : > { %p924_p7 = pnand %p922_p2, %p863_p3 }
  0x32   : > { %p929_p11 = por %p928_p10, %p927_p8 }
  0x33   : > { %p925_p9 = pneg %p924_p7 }
  0x35   : > { %p930_p12 = pnand %p929_p11, %p925_p9 }
  0x37   : > { %933 = shalt.err (!%p930_p12)
}
  0x38   : > { %739 = dma.hbm_to_vmem [thread:$0]  (!%p1155_p0), %s270_s10, 16, %s272_s0, %s1162_s13  }
  0x39   : > { %280 = sbr.rel (%p1107_p6) target bundleno = 524 (0x20c), region = 44 }
  0x3e   : > { %994 = dma.done.wait (%p82_p1), [#allocation3], 256  }
  0x3f   : > { %996 = vsyncadd (%p82_p1), [#allocation3], 4294967040 }
  0x40   : > { %998 = dma.done.wait (%p82_p1), [#allocation6], 256  }
  0x41   : > { %1000 = vsyncadd (%p82_p1), [#allocation6], 4294967040  ;;  %s292_s1 = sand.u32 1, %s1091_s25   ;;  %s294_s0 = sand.u32 1, %s1019_s22  }
  0x42   : > { %s675_s13 = sshll.u32 %s294_s0, 7  ;;  %s293_s30 = scalar_lea.sflag [#allocation3], %s292_s1 }
  0x43   : > { %s1216_s27 = scalar_lea.vmem [#allocation7], %s675_s13 }
  0x44   : > { %1002 = dma.done.wait (%p1100_p5), %s293_s30, 2064  }
  0x45   : > { %1004 = vsyncadd (%p1100_p5), %s293_s30, 4294965232  ;;  %s1222_s16 = scalar_lea.vmem [#allocation8], %s294_s0 }
  0x46   : > { %1006 = dma.done.wait (%p82_p1), [#allocation6], 4096  }
  0x47   : > { %1008 = vsyncadd (%p82_p1), [#allocation6], 4294963200  ;;  %342 = sbr.rel (%p665_p4) target bundleno = 79 (0x4f), region = 68 }
  0x4c   : > { %v343_v0 = vld [vmem:[#allocation5] sm:$0xff]  ;;  %v344_v1 = vld [vmem:[#allocation5 + $0x8] sm:$0xff] }
  0x4d   : > { %345 = vst [vmem:[#allocation10] sm:$0xff] %v343_v0 }
  0x4e   : > { %346 = vst [vmem:[#allocation10 + $0x8] sm:$0xff] %v344_v1 }
  0x4f PF: > { %v349_v4 = vld [vmem:[#allocation2] sm:$0xff]  ;;  %vm351_vm0 = vcmask 130048   ;;  %v396_v5 = vld [vmem:[%s1216_s27 + $0x78] sm:$0xff]  ;;  %v395_v6 = vld [vmem:[%s1216_s27 + $0x70] sm:$0xff]  ;;  %s1034_s29 = smov [#allocation10]   ;;  %s565_s10 = sshll.u32 %s1285_s6, 4  ;;  %s566_s10 = int_to_ptr.hbm [resolvable:$true] %s565_s10 }
  0x50   : > { %687 = vmatpush.msra.mxu1 %v396_v5  ;;  %v394_v7 = vld [vmem:[%s1216_s27 + $0x68] sm:$0xff]  ;;  %v393_v8 = vld [vmem:[%s1216_s27 + $0x60] sm:$0xff]  ;;  %v392_v10 = vld [vmem:[%s1216_s27 + $0x58] sm:$0xff]  ;;  %s563_s8 = sshll.u32 %s1034_s29, 4  ;;  %p747_p1 = scmp.eq.s32.totalorder %s1091_s25, 2  ;;  %s564_s8 = int_to_ptr.vmem [resolvable:$true] %s563_s8 }
  0x51   : > { %v350_v9 = vld [vmem:[#allocation2 + $0x8] sm:$0xff]  ;;  %v391_v11 = vld [vmem:[%s1216_s27 + $0x50] sm:$0xff]  ;;  %v389_v13 = vld [vmem:[%s1216_s27 + $0x40] sm:$0xff]  ;;  %s1035_s12 = smov 128   ;;  %s1036_s18 = smov 8  }
  0x52   : > { %688 = vmatpush.msra.mxu1 %v395_v6  ;;  %v390_v12 = vld [vmem:[%s1216_s27 + $0x48] sm:$0xff]  ;;  %v388_v14 = vld [vmem:[%s1216_s27 + $0x38] sm:$0xff]  ;;  %v387_v15 = vld [vmem:[%s1216_s27 + $0x30] sm:$0xff] }
  0x53   : > { %v386_v16 = vld [vmem:[%s1216_s27 + $0x28] sm:$0xff]  ;;  %v385_v17 = vld [vmem:[%s1216_s27 + $0x20] sm:$0xff]  ;;  %v384_v18 = vld [vmem:[%s1216_s27 + $0x18] sm:$0xff] }
  0x54   : > { %v1232_v3 = vld [vmem:[#allocation10] sm:$0xff]  ;;  %689 = vmatpush.msra.mxu1 %v394_v7  ;;  %v383_v19 = vld [vmem:[%s1216_s27 + $0x10] sm:$0xff]  ;;  %v445_v22 = vld [vmem:[#allocation9 + $0x78] sm:$0xff] }
  0x55   : > { %v1230_v2 = vld [vmem:[#allocation10 + $0x8] sm:$0xff]  ;;  %v381_v21 = vld [vmem:[%s1216_s27] sm:$0xff]  ;;  %v444_v23 = vld [vmem:[#allocation9 + $0x70] sm:$0xff]  ;;  %466 = vmatpush.msra.mxu2 %v445_v22 }
  0x56   : > { %372 = vmatpush.msra.mxu0 %v1230_v2  ;;  %690 = vmatpush.msra.mxu1 %v393_v8  ;;  %v382_v20 = vld [vmem:[%s1216_s27 + $0x8] sm:$0xff]  ;;  %v461_v24 = vld [vmem:[#allocation9 + $0xf8] sm:$0xff]  ;;  %v460_v25 = vld [vmem:[#allocation9 + $0xf0] sm:$0xff] }
  0x57   : > { %489 = vmatpush.msra.mxu3 %v461_v24  ;;  %v443_v26 = vld [vmem:[#allocation9 + $0x68] sm:$0xff]  ;;  %467 = vmatpush.msra.mxu2 %v444_v23  ;;  %v442_v28 = vld [vmem:[#allocation9 + $0x60] sm:$0xff]  ;;  %v441_v30 = vld [vmem:[#allocation9 + $0x58] sm:$0xff] }
  0x58   : > { %373 = vmatpush.msra.mxu0 %v1232_v3  ;;  %691 = vmatpush.msra.mxu1 %v392_v10  ;;  %v459_v27 = vld [vmem:[#allocation9 + $0xe8] sm:$0xff]  ;;  %v458_v29 = vld [vmem:[#allocation9 + $0xe0] sm:$0xff]  ;;  %v457_v31 = vld [vmem:[#allocation9 + $0xd8] sm:$0xff] }
  0x59   : > { %678 = vmatmul.msk.f32.vlgmr.msra.gmra.mxu0 %vm351_vm0, %v349_v4  ;;  %490 = vmatpush.msra.mxu3 %v460_v25  ;;  %v440_v32 = vld [vmem:[#allocation9 + $0x50] sm:$0xff]  ;;  %v439_v34 = vld [vmem:[#allocation9 + $0x48] sm:$0xff]  ;;  %v438_v36 = vld [vmem:[#allocation9 + $0x40] sm:$0xff] }
  0x5a   : > { %401 = vmatpush.msrb.mxu0 %v396_v5  ;;  %692 = vmatpush.msra.mxu1 %v391_v11  ;;  %v456_v33 = vld [vmem:[#allocation9 + $0xd0] sm:$0xff]  ;;  %v455_v35 = vld [vmem:[#allocation9 + $0xc8] sm:$0xff]  ;;  %v454_v37 = vld [vmem:[#allocation9 + $0xc0] sm:$0xff] }
  0x5b   : > { %468 = vmatpush.msra.mxu2 %v443_v26  ;;  %491 = vmatpush.msra.mxu3 %v459_v27  ;;  %v437_v38 = vld [vmem:[#allocation9 + $0x38] sm:$0xff]  ;;  %v436_v40 = vld [vmem:[#allocation9 + $0x30] sm:$0xff]  ;;  %v435_v42 = vld [vmem:[#allocation9 + $0x28] sm:$0xff] }
  0x5c   : > { %402 = vmatpush.msrb.mxu0 %v395_v6  ;;  %693 = vmatpush.msra.mxu1 %v390_v12  ;;  %v453_v39 = vld [vmem:[#allocation9 + $0xb8] sm:$0xff]  ;;  %v452_v41 = vld [vmem:[#allocation9 + $0xb0] sm:$0xff]  ;;  %v451_v43 = vld [vmem:[#allocation9 + $0xa8] sm:$0xff] }
  0x5d   : > { %469 = vmatpush.msra.mxu2 %v442_v28  ;;  %492 = vmatpush.msra.mxu3 %v458_v29  ;;  %v434_v44 = vld [vmem:[#allocation9 + $0x20] sm:$0xff]  ;;  %v433_v46 = vld [vmem:[#allocation9 + $0x18] sm:$0xff]  ;;  %v432_v49 = vld [vmem:[#allocation9 + $0x10] sm:$0xff] }
  0x5e   : > { %403 = vmatpush.msrb.mxu0 %v394_v7  ;;  %694 = vmatpush.msra.mxu1 %v389_v13  ;;  %v450_v45 = vld [vmem:[#allocation9 + $0xa0] sm:$0xff]  ;;  %v449_v47 = vld [vmem:[#allocation9 + $0x98] sm:$0xff]  ;;  %v431_v51 = vld [vmem:[#allocation9 + $0x8] sm:$0xff] }
  0x5f   : > { %470 = vmatpush.msra.mxu2 %v441_v30  ;;  %493 = vmatpush.msra.mxu3 %v457_v31  ;;  %v448_v52 = vld [vmem:[#allocation9 + $0x90] sm:$0xff]  ;;  %v430_v53 = vld [vmem:[#allocation9] sm:$0xff]  ;;  %v447_v54 = vld [vmem:[#allocation9 + $0x88] sm:$0xff] }
  0x60   : > { %404 = vmatpush.msrb.mxu0 %v393_v8  ;;  %695 = vmatpush.msra.mxu1 %v388_v14  ;;  %v446_v55 = vld [vmem:[#allocation9 + $0x80] sm:$0xff]  ;;  %v789_v56 = vld [vmem:[%s1222_s16] ss:$0 sm:$0xff] }
  0x61   : > { %679 = vmatmul.msk.f32.gmra.mxu0 %vm351_vm0, %v350_v9  ;;  %471 = vmatpush.msra.mxu2 %v440_v32  ;;  %v790_v4 = vld [vmem:[%s1284_s5] ss:$0 sm:$0xff] }
  0x62   : > { %405 = vmatpush.msrb.mxu0 %v392_v10  ;;  %696 = vmatpush.msra.mxu1 %v387_v15 }
  0x63   : > { %494 = vmatpush.msra.mxu3 %v456_v33  ;;  %472 = vmatpush.msra.mxu2 %v439_v34 }
  0x64   : > { %406 = vmatpush.msrb.mxu0 %v391_v11  ;;  %697 = vmatpush.msra.mxu1 %v386_v16 }
  0x65   : > { %495 = vmatpush.msra.mxu3 %v455_v35  ;;  %473 = vmatpush.msra.mxu2 %v438_v36 }
  0x66   : > { %407 = vmatpush.msrb.mxu0 %v390_v12  ;;  %698 = vmatpush.msra.mxu1 %v385_v17 }
  0x67   : > { %496 = vmatpush.msra.mxu3 %v454_v37  ;;  %474 = vmatpush.msra.mxu2 %v437_v38 }
  0x68   : > { %408 = vmatpush.msrb.mxu0 %v389_v13  ;;  %699 = vmatpush.msra.mxu1 %v384_v18 }
  0x69   : > { %497 = vmatpush.msra.mxu3 %v453_v39  ;;  %475 = vmatpush.msra.mxu2 %v436_v40 }
  0x6a   : > { %409 = vmatpush.msrb.mxu0 %v388_v14  ;;  %700 = vmatpush.msra.mxu1 %v383_v19 }
  0x6b   : > { %498 = vmatpush.msra.mxu3 %v452_v41  ;;  %476 = vmatpush.msra.mxu2 %v435_v42 }
  0x6c   : > { %410 = vmatpush.msrb.mxu0 %v387_v15  ;;  %701 = vmatpush.msra.mxu1 %v382_v20 }
  0x6d   : > { %499 = vmatpush.msra.mxu3 %v451_v43  ;;  %477 = vmatpush.msra.mxu2 %v434_v44 }
  0x6e   : > { %411 = vmatpush.msrb.mxu0 %v386_v16  ;;  %702 = vmatpush.msra.mxu1 %v381_v21 }
  0x6f   : > { %500 = vmatpush.msra.mxu3 %v450_v45  ;;  %478 = vmatpush.msra.mxu2 %v433_v46 }
  0x70   : > { %412 = vmatpush.msrb.mxu0 %v385_v17 }
  0x71   : > { %501 = vmatpush.msra.mxu3 %v449_v47  ;;  %479 = vmatpush.msra.mxu2 %v432_v49 }
  0x72   : > { %413 = vmatpush.msrb.mxu0 %v384_v18 }
  0x73   : > { %480 = vmatpush.msra.mxu2 %v431_v51  ;;  %502 = vmatpush.msra.mxu3 %v448_v52 }
  0x74   : > { %414 = vmatpush.msrb.mxu0 %v383_v19 }
  0x75   : > { %481 = vmatpush.msra.mxu2 %v430_v53  ;;  %503 = vmatpush.msra.mxu3 %v447_v54 }
  0x76   : > { %415 = vmatpush.msrb.mxu0 %v382_v20  ;;  %482 = vmatmul.f32.vlgmr.msra.gmra.mxu2 %v1232_v3 }
  0x77   : > { %504 = vmatpush.msra.mxu3 %v446_v55 }
  0x78   : > { %416 = vmatpush.msrb.mxu0 %v381_v21 }
  0x7e   : > { %485 = vmatmul.f32.gmra.mxu2 %v1230_v2 }
  0xd6   : > { %v375_v48 = vpop.f32.mrf.mxu0 }
  0xd7   : > { %417 = vmatmul.f32.vlgmr.msrb.gmra.mxu0 %v375_v48 }
  0xde   : > { %v378_v50 = vpop.f32.mrf.mxu0 }
  0xdf   : > { %420 = vmatmul.f32.vlgmr.msra.gmra.mxu1 %v378_v50 }
  0xf9   : > { %v483_v1 = vpop.f32.mrf.mxu2 }
  0xfa   : > { %v484_v5 = vadd.f32 %v790_v4, %v483_v1 }
 0x101   : > { %v486_v8 = vpop.f32.mrf.mxu2 }
 0x102   : > { %v487_v10 = vadd.f32 %v790_v4, %v486_v8 }
 0x154   : > { %v418_v57 = vpop.f32.mrf.mxu0 }
 0x155   : > { %v419_v58 = vadd.f32 %v789_v56, %v418_v57 }
 0x157   : > { %v426_v59 = vmul.f32 0.01, %v419_v58  ;;  %vm424_vm1 = vcmp.gt.f32.partialorder %v419_v58, 0.0 }
 0x159   : > { %v428_v60 = vsel %vm424_vm1, %v419_v58, %v426_v59 }
 0x15a   : > { %505 = vmatmul.f32.vlgmr.msra.gmra.mxu3 %v428_v60  ;;  %v550_v27 = vsub.f32 %v1232_v3, %v428_v60 }
 0x15c   : > { %v421_v61 = vpop.f32.mrf.mxu1 }
 0x15d   : > { %v422_v62 = vadd.f32 %v789_v56, %v421_v61 }
 0x15f   : > { %v427_v63 = vmul.f32 0.01, %v422_v62  ;;  %vm425_vm2 = vcmp.gt.f32.partialorder %v422_v62, 0.0 }
 0x161   : > { %v429_v0 = vsel %vm425_vm2, %v422_v62, %v427_v63 }
 0x162   : > { %508 = vmatmul.f32.gmra.mxu3 %v429_v0  ;;  %v551_v39 = vsub.f32 %v1230_v2, %v429_v0 }
 0x1dd   : > { %v506_v6 = vpop.f32.mrf.mxu3 }
 0x1de   : > { %v507_v7 = vadd.f32 %v506_v6, %v484_v5 }
 0x1e0   : > { %v680_v9 = vmul.f32 -1.442695, %v507_v7 }
 0x1e2   : > { %791 = vpow2.f32 %v680_v9 }
 0x1e5   : > { %v509_v11 = vpop.f32.mrf.mxu3 }
 0x1e6   : > { %v510_v12 = vadd.f32 %v509_v11, %v487_v10 }
 0x1e8   : > { %v792_v13 = vpop.eup %791  ;;  %v681_v14 = vmul.f32 -1.442695, %v510_v12 }
 0x1e9   : > { %v518_v15 = vadd.f32 1.0, %v792_v13 }
 0x1ea   : > { %793 = vpow2.f32 %v681_v14 }
 0x1eb   : > { %795 = vrcp.f32 %v518_v15  ;;  %v531_v21 = vand.u32 2147483648, %v518_v15  ;;  %v529_v23 = vand.u32 2147483647, %v518_v15  ;;  %vm525_vm4 = vweird.f32 %v518_v15 }
 0x1ed   : > { %v532_v26 = vor.u32 1.1754944e-38, %v531_v21  ;;  %vm530_vm6 = vcmp.eq.f32.partialorder %v529_v23, 8.507059e+37 }
 0x1f0   : > { %v794_v16 = vpop.eup %793 }
 0x1f1   : > { %v796_v17 = vpop.eup %795  ;;  %v519_v18 = vadd.f32 1.0, %v794_v16 }
 0x1f2   : > { %v521_v19 = vmul.f32 %v796_v17, %v518_v15  ;;  %vm526_vm3 = vweird.f32 %v796_v17 }
 0x1f3   : > { %797 = vrcp.f32 %v519_v18  ;;  %vm527_vm5 = vmor %vm525_vm4, %vm526_vm3  ;;  %v546_v33 = vand.u32 2147483648, %v519_v18  ;;  %v544_v35 = vand.u32 2147483647, %v519_v18  ;;  %vm540_vm8 = vweird.f32 %v519_v18 }
 0x1f4   : > { %v522_v20 = vsub.f32 1.0, %v521_v19 }
 0x1f5   : > { %v547_v38 = vor.u32 1.1754944e-38, %v546_v33  ;;  %vm545_vm10 = vcmp.eq.f32.partialorder %v544_v35, 8.507059e+37 }
 0x1f6   : > { %v523_v22 = vmul.f32 %v796_v17, %v522_v20 }
 0x1f8   : > { %v524_v24 = vadd.f32 %v796_v17, %v523_v22 }
 0x1f9   : > { %v798_v25 = vpop.eup %797 }
 0x1fa   : > { %v536_v28 = vmul.f32 %v798_v25, %v519_v18  ;;  %v528_v29 = vsel %vm527_vm5, %v796_v17, %v524_v24  ;;  %vm541_vm7 = vweird.f32 %v798_v25 }
 0x1fb   : > { %v533_v30 = vsel %vm530_vm6, %v532_v26, %v528_v29  ;;  %vm542_vm9 = vmor %vm540_vm8, %vm541_vm7 }
 0x1fc   : > { %v537_v31 = vsub.f32 1.0, %v536_v28  ;;  %v552_v32 = vmul.f32 %v550_v27, %v533_v30 }
 0x1fe   : > { %v538_v34 = vmul.f32 %v798_v25, %v537_v31  ;;  %v554_v36 = vadd.f32 %v552_v32, %v428_v60 }
 0x200   : > { %v539_v37 = vadd.f32 %v798_v25, %v538_v34  ;;  %556 = vst [vmem:[#allocation10] sm:$0xff] %v554_v36 }
 0x202   : > { %v543_v3 = vsel %vm542_vm9, %v798_v25, %v539_v37 }
 0x203   : > { %v548_v40 = vsel %vm545_vm10, %v547_v38, %v543_v3 }
 0x204   : > { %v553_v41 = vmul.f32 %v551_v39, %v548_v40 }
 0x206   : > { %v555_v42 = vadd.f32 %v553_v41, %v429_v0 }
 0x208   : > { %557 = vst [vmem:[#allocation10 + $0x8] sm:$0xff] %v555_v42 }
 0x209   : > { %720 = dma.vmem_to_hbm [thread:$0]  (%p747_p1), %s564_s8, 256, %s566_s10, [#allocation4], %s1035_s12, %s1035_s12, %s1036_s18  }
 0x20a   : > { %1010 = dma.done.wait (%p747_p1), [#allocation4], 256  }
 0x20b   : > { %1012 = vsyncadd (%p747_p1), [#allocation4], 4294967040 }
 0x20c PF: > { %s1299_s11 = smov %s1144_s21  ;;  %p16_p4 = scmp.ge.s32.totalorder %s1133_s17, 5  }
 0x20d   : > { %s1300_s21 = smov %s1019_s22  ;;  %s1301_s22 = smov %s1023_s23 }
 0x20e   : > { %s1302_s23 = smov %s1299_s11  ;;  %s1303_s24 = smov %s1133_s17 }
 0x20f   :  { %18 = sbr.rel (!%p16_p4) target bundleno = 7 (0x7), region = 107 }
 0x214   :  { %582 = vsyncpa [#allocation3], 1 }
 0x215   :  { %584 = vsyncpa [#allocation3 + $0x1], 1 }
 0x216   :  { %585 = vsyncpa [#allocation6], 1 }
 0x217   :  { %586 = vsyncpa [#allocation4], 1 }
 0x218   :  { %588 = vsyncpa [#allocation4 + $0x1], 1 }

</bundles_post_ra>
